<compile_context>
chip_gen: v6e
topology: v6e:2x2x1
jax: 0.10.0
libtpu: 0.0.40
codegen_flags: <defaults>
</compile_context>

<pallas_src>
import functools

import jax
import jax.numpy as jnp
from jax import lax
from jax.experimental import pallas as pl
from jax.experimental.pallas import tpu as pltpu

_LANES = 128
_K = 8  # padded contraction dim of the plane matmul: [px, py, 1, 0, 0, 0, 0, 0]


def _round_up(x, m):
    return ((x + m - 1) // m) * m


def _raster_kernel(cmat_ref, zbuf_ref, *, n_chunks, tile_rows, height, width):
    """One grid step = (batch element b, row-tile rt) of the flattened image.

    cmat_ref : VMEM (4*n_chunks, Fc, 8) f32, chunk-major.  For face chunk c,
               cmat_ref[4*c + p] holds the rows [A, B, C, 0, 0, 0, 0, 0] of
               plane p (p = 0,1,2 -> edge functions with sign(area) folded in,
               p = 3 -> z-plane pre-divided by the signed area).
    zbuf_ref : VMEM (tile_rows, 128) f32 output z-buffer tile (lane-dense
               flattened pixels: pixel = (rt*tile_rows + row)*128 + lane).
    """
    rt = pl.program_id(1)

    # Hoisted iotas (one vreg each); pixel coords are derived per row below.
    lane = lax.broadcasted_iota(jnp.int32, (_K, _LANES), 1)
    sub = lax.broadcasted_iota(jnp.int32, (_K, _LANES), 0)

    pow2 = (width & (width - 1)) == 0
    inv_w = 2.0 / width
    inv_h = 2.0 / height

    dot = functools.partial(jnp.dot, precision=lax.Precision.HIGHEST,
                            preferred_element_type=jnp.float32)

    def row_body(r, carry):
        # --- 128 pixels of one output row -> P = [px; py; 1; 0...] (8,128) ---
        pix = (rt * tile_rows + r) * _LANES + lane
        if pow2:
            shift = width.bit_length() - 1
            xi = pix & (width - 1)
            yi = pix >> shift
            px = (xi.astype(jnp.float32) + 0.5) * inv_w - 1.0
            py = (yi.astype(jnp.float32) + 0.5) * inv_h - 1.0
        else:
            # TODO(synk): float floor-div path; exact below ~2M pixels.
            t = (pix.astype(jnp.float32) + 0.5) * (1.0 / float(width))
            yf = jnp.floor(t)
            px = 2.0 * (t - yf) - 1.0
            py = (yf + 0.5) * inv_h - 1.0
        p_mat = jnp.where(sub == 0, px,
                jnp.where(sub == 1, py,
                jnp.where(sub == 2, 1.0, 0.0))).astype(jnp.float32)

        def chunk_body(c, zrow):
            base = c * 4
            # Plane evaluations on the MXU: (Fc, 8) @ (8, 128) -> (Fc, 128).
            w0 = dot(cmat_ref[base + 0], p_mat)
            w1 = dot(cmat_ref[base + 1], p_mat)
            w2 = dot(cmat_ref[base + 2], p_mat)
            zz = dot(cmat_ref[base + 3], p_mat)
            # Coverage + depth reduction on the VPU (~5 ops/face/vreg).
            m = jnp.minimum(jnp.minimum(w0, w1), w2)
            zc = jnp.where(m >= 0.0, zz, jnp.inf)
            return jnp.minimum(zrow, jnp.min(zc, axis=0, keepdims=True))

        zrow0 = jnp.full((1, _LANES), jnp.inf, dtype=jnp.float32)
        if n_chunks == 1:
            zrow = chunk_body(0, zrow0)
        else:
            zrow = lax.fori_loop(0, n_chunks, chunk_body, zrow0)

        # PyTorch3D convention: zbuf == -1 where no face covers the pixel.
        zbuf_ref[pl.ds(r, 1), :] = jnp.where(zrow == jnp.inf, -1.0, zrow)
        return carry

    lax.fori_loop(0, tile_rows, row_body, 0)


def _face_plane_matrix(verts_ndc, faces_idx, n_chunks, fc):
    """(N, 4*n_chunks, fc, 8) per-face plane-coefficient matrix (MXU layout)."""
    N = verts_ndc.shape[0]
    F = faces_idx.shape[0]
    f_pad = n_chunks * fc

    fv = verts_ndc[:, faces_idx, :].astype(jnp.float32)        # (N, F, 3, 3)
    x0, y0, z0 = fv[..., 0, 0], fv[..., 0, 1], fv[..., 0, 2]
    x1, y1, z1 = fv[..., 1, 0], fv[..., 1, 1], fv[..., 1, 2]
    x2, y2, z2 = fv[..., 2, 0], fv[..., 2, 1], fv[..., 2, 2]

    # Edge functions as planes: w_i(px, py) = A_i*px + B_i*py + C_i.
    A0, B0 = -(y2 - y1), (x2 - x1)
    C0 = (y2 - y1) * x1 - (x2 - x1) * y1
    A1, B1 = -(y0 - y2), (x0 - x2)
    C1 = (y0 - y2) * x2 - (x0 - x2) * y2
    A2, B2 = -(y1 - y0), (x1 - x0)
    C2 = (y1 - y0) * x0 - (x1 - x0) * y0

    area = (x1 - x0) * (y2 - y0) - (y1 - y0) * (x2 - x0)
    degen = area == 0.0
    sgn = jnp.sign(area)
    inv_area = jnp.where(degen, 0.0, 1.0 / jnp.where(degen, 1.0, area))

    # Fold sign(area) into the edge planes so coverage is just min(w) >= 0
    # (back-facing triangles still rasterized, cull_backfaces=False).
    Ae0, Be0 = A0 * sgn, B0 * sgn
    Ce0 = jnp.where(degen, -1.0, C0 * sgn)   # degenerate face -> never inside
    Ae1, Be1, Ce1 = A1 * sgn, B1 * sgn, C1 * sgn
    Ae2, Be2, Ce2 = A2 * sgn, B2 * sgn, C2 * sgn

    # z-plane (barycentric z interpolation pre-divided by the signed area).
    Zx = (A0 * z0 + A1 * z1 + A2 * z2) * inv_area
    Zy = (B0 * z0 + B1 * z1 + B2 * z2) * inv_area
    Zc = (C0 * z0 + C1 * z1 + C2 * z2) * inv_area

    def pad(a, cval=0.0):
        return jnp.pad(a, ((0, 0), (0, f_pad - F)), constant_values=cval)

    # Padded faces get w0 === -1 so they never cover a pixel.
    w0c = jnp.stack([pad(Ae0), pad(Be0), pad(Ce0, -1.0)], axis=-1)
    w1c = jnp.stack([pad(Ae1), pad(Be1), pad(Ce1)], axis=-1)
    w2c = jnp.stack([pad(Ae2), pad(Be2), pad(Ce2)], axis=-1)
    zpc = jnp.stack([pad(Zx), pad(Zy), pad(Zc)], axis=-1)
    planes = jnp.stack([w0c, w1c, w2c, zpc], axis=1)           # (N,4,f_pad,3)
    planes = jnp.pad(planes, ((0, 0), (0, 0), (0, 0), (0, _K - 3)))
    planes = planes.reshape(N, 4, n_chunks, fc, _K).transpose(0, 2, 1, 3, 4)
    return planes.reshape(N, 4 * n_chunks, fc, _K)             # chunk-major


def mesh_renderer_with_depth(verts_ndc, faces_idx, image_size, *,
                             face_chunk=512, max_tile_rows=256):
    """Pallas equivalent of MeshRendererWithDepth.forward.

    verts_ndc : (N, V, 3) float32 vertex positions already in NDC (x, y, z)
    faces_idx : (F, 3)    int32   triangle vertex indices (shared per batch)
    returns   : (N, H, W, 1) float32 z-buffer (faces_per_pixel = 1,
                -1.0 where no face covers the pixel)
    """
    H, W = image_size
    N = verts_ndc.shape[0]
    F = faces_idx.shape[0]

    # --- face coefficient table: chunked, padded, per-batch VMEM blocks -----
    face_chunk = _round_up(face_chunk, 8)
    fc = min(_round_up(F, 8), face_chunk)
    f_pad = _round_up(F, fc)
    n_chunks = f_pad // fc
    cmat = _face_plane_matrix(verts_ndc, faces_idx, n_chunks, fc)

    # --- lane-dense flattened pixel layout: rows of 128 lanes ---------------
    P = H * W
    R = pl.cdiv(P, _LANES)
    R8 = _round_up(R, 8)                       # multiple-of-8 sublanes
    if N == 1:
        # Split rows so both v7x TensorCores get work even for batch-1 images.
        tile_rows = min(max_tile_rows, max(8, _round_up(pl.cdiv(R8, 2), 8)))
    else:
        tile_rows = min(max_tile_rows, R8)
    r_pad = _round_up(R8, tile_rows)
    n_row_tiles = r_pad // tile_rows

    kernel = functools.partial(
        _raster_kernel, n_chunks=n_chunks, tile_rows=tile_rows,
        height=H, width=W)

    zbuf_rows = pl.pallas_call(
        kernel,
        out_shape=jax.ShapeDtypeStruct((N, r_pad, _LANES), jnp.float32),
        grid=(N, n_row_tiles),
        in_specs=[
            pl.BlockSpec((None, 4 * n_chunks, fc, _K),
                         lambda b, rt: (b, 0, 0, 0)),            # per-batch VMEM
        ],
        out_specs=pl.BlockSpec((None, tile_rows, _LANES),
                               lambda b, rt: (b, rt, 0)),
        compiler_params=pltpu.CompilerParams(
            dimension_semantics=("parallel", "parallel"),
            vmem_limit_bytes=32 * 1024 * 1024),
    )(cmat)

    # Strip lane/row padding and restore NHWK (K = faces_per_pixel = 1).
    if r_pad * _LANES == P:
        zbuf = zbuf_rows.reshape(N, H, W)
    else:
        zbuf = zbuf_rows.reshape(N, r_pad * _LANES)[:, :P].reshape(N, H, W)
    return zbuf[..., None]


def _reference(verts_ndc, faces_idx, image_size):
    """Pure-JAX reference (brute-force barycentric formulation)."""
    H, W = image_size
    fv = verts_ndc[:, faces_idx, :].astype(jnp.float32)   # (N, F, 3, 3)
    xs = (jnp.arange(W, dtype=jnp.float32) + 0.5) / W * 2.0 - 1.0
    ys = (jnp.arange(H, dtype=jnp.float32) + 0.5) / H * 2.0 - 1.0
    px = jnp.broadcast_to(xs[None, :], (H, W))[None, None]        # (1,1,H,W)
    py = jnp.broadcast_to(ys[:, None], (H, W))[None, None]

    x0, y0, z0 = (fv[..., 0, i][..., None, None] for i in range(3))
    x1, y1, z1 = (fv[..., 1, i][..., None, None] for i in range(3))
    x2, y2, z2 = (fv[..., 2, i][..., None, None] for i in range(3))

    area = (x1 - x0) * (y2 - y0) - (y1 - y0) * (x2 - x0)
    w0 = (x2 - x1) * (py - y1) - (y2 - y1) * (px - x1)
    w1 = (x0 - x2) * (py - y2) - (y0 - y2) * (px - x2)
    w2 = (x1 - x0) * (py - y0) - (y1 - y0) * (px - x0)
    inv_area = 1.0 / jnp.where(area == 0.0, 1.0, area)
    b0, b1, b2 = w0 * inv_area, w1 * inv_area, w2 * inv_area
    inside = (b0 >= 0.0) & (b1 >= 0.0) & (b2 >= 0.0) & (area != 0.0)
    z = b0 * z0 + b1 * z1 + b2 * z2
    z = jnp.where(inside, z, jnp.inf)
    zmin = jnp.min(z, axis=1)                             # (N, H, W)
    hit = jnp.any(inside, axis=1)
    return jnp.where(hit, zmin, -1.0)[..., None]


if __name__ == "__main__":
    key = jax.random.PRNGKey(0)
    N, V, H, W = 2, 8, 16, 16

    kxy, kz = jax.random.split(key)
    verts_xy = jax.random.uniform(kxy, (N, V, 2), jnp.float32, -0.9, 0.9)
    verts_z = jax.random.uniform(kz, (N, V, 1), jnp.float32, 0.2, 1.0)
    verts_ndc = jnp.concatenate([verts_xy, verts_z], axis=-1)     # (N, V, 3)

    faces_idx = jnp.array(
        [[0, 1, 2], [2, 3, 4], [4, 5, 6], [5, 6, 7]], dtype=jnp.int32)

    zbuf = mesh_renderer_with_depth(verts_ndc, faces_idx, (H, W))
    zbuf = jax.block_until_ready(zbuf)

    ref = _reference(verts_ndc, faces_idx, (H, W))
    assert zbuf.shape == (N, H, W, 1), zbuf.shape
    assert zbuf.dtype == jnp.float32
    assert jnp.allclose(zbuf, ref, atol=1e-4, rtol=1e-4), (
        float(jnp.max(jnp.abs(zbuf - ref))))

    print("KERNEL_OK")
</pallas_src>

<mosaic_0001>
module attributes {stable_mosaic.version = 11 : i64} {
  func.func @_raster_kernel(%arg0: i32, %arg1: i32, %arg2: memref<1x4x8x8xf32, #tpu.memory_space<vmem>>, %arg3: memref<1x8x128xf32, #tpu.memory_space<vmem>>) attributes {dimension_semantics = [#tpu.dimension_semantics<parallel>, #tpu.dimension_semantics<parallel>], iteration_bounds = array<i64: 2, 1>, scalar_prefetch = 0 : i64, scratch_operands = 0 : i64, tpu.core_type = #tpu.core_type<tc>, window_params = [{transform_indices = @transform_0, window_bounds = array<i64: 1, 4, 8, 8>}, {transform_indices = @transform_1, window_bounds = array<i64: 1, 8, 128>}]} {
    %0 = tpu.iota {dimensions = array<i32: 1>} : vector<8x128xi32>
    %1 = tpu.iota {dimensions = array<i32: 0>} : vector<8x128xi32>
    %c0_i32 = arith.constant 0 : i32
    %c8_i32 = arith.constant 8 : i32
    %2 = arith.addi %c0_i32, %c8_i32 : i32
    %c1_i32 = arith.constant 1 : i32
    scf.for %arg4 = %c0_i32 to %2 step %c1_i32  : i32 {
      %c8_i32_1 = arith.constant 8 : i32
      %3 = arith.muli %arg1, %c8_i32_1 : i32
      %4 = arith.addi %3, %arg4 : i32
      %c128_i32 = arith.constant 128 : i32
      %5 = arith.muli %4, %c128_i32 : i32
      %6 = vector.broadcast %5 : i32 to vector<8x128xi32>
      %7 = arith.addi %6, %0 : vector<8x128xi32>
      %c15_i32 = arith.constant 15 : i32
      %8 = vector.broadcast %c15_i32 : i32 to vector<8x128xi32>
      %9 = arith.andi %7, %8 : vector<8x128xi32>
      %c4_i32 = arith.constant 4 : i32
      %10 = vector.broadcast %c4_i32 : i32 to vector<8x128xi32>
      %11 = arith.shrsi %7, %10 : vector<8x128xi32>
      %12 = arith.sitofp %9 : vector<8x128xi32> to vector<8x128xf32>
      %cst = arith.constant 5.000000e-01 : f32
      %13 = vector.broadcast %cst : f32 to vector<8x128xf32>
      %14 = arith.addf %12, %13 : vector<8x128xf32>
      %cst_2 = arith.constant 1.250000e-01 : f32
      %15 = vector.broadcast %cst_2 : f32 to vector<8x128xf32>
      %16 = arith.mulf %14, %15 : vector<8x128xf32>
      %cst_3 = arith.constant 1.000000e+00 : f32
      %17 = vector.broadcast %cst_3 : f32 to vector<8x128xf32>
      %18 = arith.subf %16, %17 : vector<8x128xf32>
      %19 = arith.sitofp %11 : vector<8x128xi32> to vector<8x128xf32>
      %cst_4 = arith.constant 5.000000e-01 : f32
      %20 = vector.broadcast %cst_4 : f32 to vector<8x128xf32>
      %21 = arith.addf %19, %20 : vector<8x128xf32>
      %cst_5 = arith.constant 1.250000e-01 : f32
      %22 = vector.broadcast %cst_5 : f32 to vector<8x128xf32>
      %23 = arith.mulf %21, %22 : vector<8x128xf32>
      %cst_6 = arith.constant 1.000000e+00 : f32
      %24 = vector.broadcast %cst_6 : f32 to vector<8x128xf32>
      %25 = arith.subf %23, %24 : vector<8x128xf32>
      %c0_i32_7 = arith.constant 0 : i32
      %26 = vector.broadcast %c0_i32_7 : i32 to vector<8x128xi32>
      %27 = arith.cmpi eq, %1, %26 : vector<8x128xi32>
      %c1_i32_8 = arith.constant 1 : i32
      %28 = vector.broadcast %c1_i32_8 : i32 to vector<8x128xi32>
      %29 = arith.cmpi eq, %1, %28 : vector<8x128xi32>
      %c2_i32 = arith.constant 2 : i32
      %30 = vector.broadcast %c2_i32 : i32 to vector<8x128xi32>
      %31 = arith.cmpi eq, %1, %30 : vector<8x128xi32>
      %cst_9 = arith.constant 1.000000e+00 : f32
      %cst_10 = arith.constant 0.000000e+00 : f32
      %32 = vector.broadcast %cst_9 : f32 to vector<8x128xf32>
      %33 = vector.broadcast %cst_10 : f32 to vector<8x128xf32>
      %34 = arith.select %31, %32, %33 : vector<8x128xi1>, vector<8x128xf32>
      %35 = arith.select %29, %25, %34 : vector<8x128xi1>, vector<8x128xf32>
      %36 = arith.select %27, %18, %35 : vector<8x128xi1>, vector<8x128xf32>
      %cst_11 = arith.constant 0x7F800000 : f32
      %37 = vector.broadcast %cst_11 : f32 to vector<1x128xf32>
      %c0 = arith.constant 0 : index
      %c0_12 = arith.constant 0 : index
      %c0_13 = arith.constant 0 : index
      %c0_14 = arith.constant 0 : index
      %38 = vector.load %arg2[%c0, %c0_12, %c0_13, %c0_14] : memref<1x4x8x8xf32, #tpu.memory_space<vmem>>, vector<1x1x8x8xf32>
      %39 = vector.shape_cast %38 : vector<1x1x8x8xf32> to vector<8x8xf32>
      %cst_15 = arith.constant dense<0.000000e+00> : vector<8x128xf32>
      %40 = tpu.matmul %39, %36, %cst_15 {dimension_numbers = #tpu.dot_dimension_numbers<[1], [0], [0], [1], [0, 0, 1, 1], [], []>, precision = #tpu.contract_precision<fp32>} : vector<8x8xf32>, vector<8x128xf32>, vector<8x128xf32> -> vector<8x128xf32>
      %c0_16 = arith.constant 0 : index
      %c1 = arith.constant 1 : index
      %c0_17 = arith.constant 0 : index
      %c0_18 = arith.constant 0 : index
      %41 = vector.load %arg2[%c0_16, %c1, %c0_17, %c0_18] : memref<1x4x8x8xf32, #tpu.memory_space<vmem>>, vector<1x1x8x8xf32>
      %42 = vector.shape_cast %41 : vector<1x1x8x8xf32> to vector<8x8xf32>
      %cst_19 = arith.constant dense<0.000000e+00> : vector<8x128xf32>
      %43 = tpu.matmul %42, %36, %cst_19 {dimension_numbers = #tpu.dot_dimension_numbers<[1], [0], [0], [1], [0, 0, 1, 1], [], []>, precision = #tpu.contract_precision<fp32>} : vector<8x8xf32>, vector<8x128xf32>, vector<8x128xf32> -> vector<8x128xf32>
      %c0_20 = arith.constant 0 : index
      %c2 = arith.constant 2 : index
      %c0_21 = arith.constant 0 : index
      %c0_22 = arith.constant 0 : index
      %44 = vector.load %arg2[%c0_20, %c2, %c0_21, %c0_22] : memref<1x4x8x8xf32, #tpu.memory_space<vmem>>, vector<1x1x8x8xf32>
      %45 = vector.shape_cast %44 : vector<1x1x8x8xf32> to vector<8x8xf32>
      %cst_23 = arith.constant dense<0.000000e+00> : vector<8x128xf32>
      %46 = tpu.matmul %45, %36, %cst_23 {dimension_numbers = #tpu.dot_dimension_numbers<[1], [0], [0], [1], [0, 0, 1, 1], [], []>, precision = #tpu.contract_precision<fp32>} : vector<8x8xf32>, vector<8x128xf32>, vector<8x128xf32> -> vector<8x128xf32>
      %c0_24 = arith.constant 0 : index
      %c3 = arith.constant 3 : index
      %c0_25 = arith.constant 0 : index
      %c0_26 = arith.constant 0 : index
      %47 = vector.load %arg2[%c0_24, %c3, %c0_25, %c0_26] : memref<1x4x8x8xf32, #tpu.memory_space<vmem>>, vector<1x1x8x8xf32>
      %48 = vector.shape_cast %47 : vector<1x1x8x8xf32> to vector<8x8xf32>
      %cst_27 = arith.constant dense<0.000000e+00> : vector<8x128xf32>
      %49 = tpu.matmul %48, %36, %cst_27 {dimension_numbers = #tpu.dot_dimension_numbers<[1], [0], [0], [1], [0, 0, 1, 1], [], []>, precision = #tpu.contract_precision<fp32>} : vector<8x8xf32>, vector<8x128xf32>, vector<8x128xf32> -> vector<8x128xf32>
      %50 = arith.minimumf %40, %43 : vector<8x128xf32>
      %51 = arith.minimumf %50, %46 : vector<8x128xf32>
      %cst_28 = arith.constant 0.000000e+00 : f32
      %52 = vector.broadcast %cst_28 : f32 to vector<8x128xf32>
      %53 = arith.cmpf oge, %51, %52 : vector<8x128xf32>
      %cst_29 = arith.constant 0x7F800000 : f32
      %54 = vector.broadcast %cst_29 : f32 to vector<8x128xf32>
      %55 = arith.select %53, %49, %54 : vector<8x128xi1>, vector<8x128xf32>
      %cst_30 = arith.constant dense<0x7F800000> : vector<128xf32>
      %56 = vector.multi_reduction <minimumf>, %55, %cst_30 [0] : vector<8x128xf32> to vector<128xf32>
      %57 = vector.shape_cast %56 : vector<128xf32> to vector<1x128xf32>
      %58 = arith.minimumf %37, %57 : vector<1x128xf32>
      %cst_31 = arith.constant 0x7F800000 : f32
      %59 = vector.broadcast %cst_31 : f32 to vector<1x128xf32>
      %60 = arith.cmpf oeq, %58, %59 : vector<1x128xf32>
      %cst_32 = arith.constant -1.000000e+00 : f32
      %61 = vector.broadcast %cst_32 : f32 to vector<1x128xf32>
      %62 = arith.select %60, %61, %58 : vector<1x128xi1>, vector<1x128xf32>
      %c0_33 = arith.constant 0 : index
      %63 = arith.index_cast %arg4 : i32 to index
      %c0_34 = arith.constant 0 : index
      %64 = vector.load %arg3[%c0_33, %63, %c0_34] : memref<1x8x128xf32, #tpu.memory_space<vmem>>, vector<1x1x128xf32>
      %65 = vector.shape_cast %64 : vector<1x1x128xf32> to vector<1x128xf32>
      %66 = vector.shape_cast %62 : vector<1x128xf32> to vector<1x1x128xf32>
      tpu.vector_store %arg3[%c0_33, %63, %c0_34], %66 {strides = array<i32>} : memref<1x8x128xf32, #tpu.memory_space<vmem>>, vector<1x1x128xf32>,
    }
    %c8_i32_0 = arith.constant 8 : i32
    return
  }
  func.func @transform_0(%arg0: i32, %arg1: i32) -> (i32, i32, i32, i32) {
    %c0_i32 = arith.constant 0 : i32
    %c0_i32_0 = arith.constant 0 : i32
    %c0_i32_1 = arith.constant 0 : i32
    %c0_i32_2 = arith.constant 0 : i32
    return %arg0, %c0_i32, %c0_i32_0, %c0_i32_1 : i32, i32, i32, i32
  }
  func.func @transform_1(%arg0: i32, %arg1: i32) -> (i32, i32, i32) {
    %c0_i32 = arith.constant 0 : i32
    %c0_i32_0 = arith.constant 0 : i32
    return %arg0, %arg1, %c0_i32 : i32, i32, i32
  }
}

</mosaic_0001>

<bundles_post_ra>
// kernel: tpu_custom_call.1
= control target key start
LH: loop header
LB: loop body
LE: loop exit
PB: predicated region body
PF: predicated region fallthrough
CT: control target
= control target key end

     0   :  { %6 = vsyncpa [#allocation3], 0  ;;  %s2793_s0 = inlined_call_operand.hbm [shape: f32[2,4,8,8], index: 0, kind: input, shape index: {}]   ;;  %s2794_s1 = inlined_call_operand.hbm [shape: f32[2,8,128], index: 1, kind: output, shape index: {}]  }
   0x1   :  { %8 = vsyncpa [#allocation3 + $0x1], 0 }
   0x2   :  { %9 = vsyncpa [#allocation4], 0 }
   0x3   :  { %11 = vsyncpa [#allocation4 + $0x1], 0  ;;  %s2495_s6 = smov 0   ;;  %s2497_s7 = smov 0  }
   0x4   :  { %s2499_s8 = smov 0   ;;  %s2501_s9 = smov 0  }
   0x5   :  { %s2503_s10 = smov 0   ;;  %s2505_s11 = smov 0  }
   0x6 LB: > { %s2098_s12 = sadd.s32 4294967295, %s2473_s11   ;;  %s2099_s13 = sadd.s32 4294967294, %s2473_s11   ;;  %s2473_s11 = sphi %s2505_s11, %s17_s11   ;;  %s2469_s10 = sphi %s2503_s10, %s2805_s10   ;;  %s2465_s9 = sphi %s2501_s9, %s2804_s9   ;;  %s2461_s8 = sphi %s2499_s8, %s2803_s8   ;;  %s2457_s7 = sphi %s2497_s7, %s2802_s7   ;;  %s2453_s6 = sphi %s2495_s6, %s2801_s6  }
   0x7   : > { %s29_s14 = sadd.s32 1, %s2469_s10  ;;  %s36_s15 = sadd.s32 1, %s2461_s8 }
   0x8   : > { %p31_p0 = scmp.ge.s32.totalorder %s29_s14, 2  ;;  %p43_p1 = scmp.ne.s32.totalorder %s2461_s8, %s2457_s7 }
   0x9   : > { %p44_p2 = scmp.eq.s32.totalorder %s2473_s11, 0  ;;  %p49_p3 = scmp.ne.s32.totalorder %s2457_s7, %s2453_s6 }
   0xa   : > { %s2807_s14 = smov (%p31_p0, %s29_s14), 0  ;;  %p50_p5 = scmp.eq.s32.totalorder %s2098_s12, 0 }
   0xb   : > { %p2536_p4 = por %p44_p2, %p43_p1  ;;  %s33_s17 = ssub.s32 %s2469_s10, %s2807_s14 }
   0xc   : > { %p75_p6 = scmp.eq.s32.totalorder %s2098_s12, 1  ;;  %p34_p7 = scmp.eq.s32.totalorder %s33_s17, 0 }
   0xd   : > { %p2542_p8 = por %p50_p5, %p49_p3  ;;  %p81_p10 = scmp.eq.s32.totalorder %s2099_s13, 1 }
   0xe   : > { %p2546_p9 = por %p75_p6, %p43_p1  ;;  %p2299_p13 = scmp.lt.s32.totalorder %s2473_s11, 2 }
   0xf   : > { %s2551_s20 = scalar_select %p34_p7, %s2461_s8, %s36_s15  }
  0x10   : > { %p2553_p11 = por %p81_p10, %p49_p3  ;;  %s101_s22 = sand.u32 1, %s2461_s8  }
  0x11   : > { %s2102_s23 = sshll.u32 %s101_s22, 5  ;;  %s2118_s24 = sshll.u32 %s2469_s10, 9 }
  0x12   : > { %s111_s27 = scalar_lea.hbm %s2793_s0, %s2118_s24  ;;  %s105_s28 = scalar_lea.vmem [#allocation2], %s2102_s23 }
  0x13   : > { %s112_s29 = sshll.u32 %s105_s28, 4  ;;  %p2566_p0 = pnand %p2299_p13, %p2536_p4  ;;  %s113_s29 = int_to_ptr.vmem [resolvable:$true] %s112_s29 }
  0x14   : > { %p2105_p1 = scmp.ge.s32.totalorder %s2473_s11, 1  ;;  %s102_s2 = scalar_lea.sflag [#allocation3], %s101_s22 }
  0x15   : > { %p2363_p2 = pneg %p2566_p0  ;;  %s2374_s3 = scalar_lea.vmem %s113_s29, 512 }
  0x16   : > { %p2375_p3 = scmp.ne.s32.totalorder %s113_s29, %s2374_s3  ;;  %s2479_s4 = smov [#allocation2]  }
  0x17   : > { %s2379_s5 = sshll.u32 %s2479_s4, 4  ;;  %s2380_s5 = int_to_ptr.vmem [resolvable:$false] %s2379_s5 }
  0x18   : > { %p2377_p5 = pnand %p2375_p3, %p2363_p2  ;;  %s2381_s12 = scalar_lea.vmem %s2380_s5, 1024 }
  0x19   : > { %p2382_p7 = scmp.lt.s32.totalorder %s113_s29, %s2380_s5  ;;  %p2383_p10 = scmp.lt.s32.totalorder %s2381_s12, %s2374_s3 }
  0x1a   : > { %p2378_p6 = pneg %p2377_p5 }
  0x1b   : > { %p2384_p12 = por %p2383_p10, %p2382_p7 }
  0x1d   : > { %p2385_p4 = pnand %p2384_p12, %p2378_p6 }
  0x1f   : > { %2388 = shalt.err (!%p2385_p4)
}
  0x20   : > { %s2480_s13 = smov 128   ;;  %s2481_s15 = smov 8  }
  0x21   : > { %2294 = dma.hbm_to_vmem [thread:$0]  (!%p2566_p0), %s111_s27, 512, %s113_s29, %s102_s2, %s2480_s13, %s2480_s13, %s2481_s15  }
  0x22   : > { %p120_p13 = scmp.lt.s32.totalorder %s2473_s11, 3 }
  0x24   : > { %p121_p2 = pnand %p2105_p1, %p120_p13 }
  0x25   : > { %s2579_s16 = sand.u32 (!%p121_p2), 1, %s2457_s7  }
  0x26   : > { %124 = sbr.rel (%p121_p2) target bundleno = 341 (0x155), region = 24  ;;  %s2106_s17 = sshll.u32 (!%p121_p2), %s2579_s16, 5 }
  0x27   : > { %s127_s22 = scalar_lea.sflag (!%p121_p2), [#allocation3], %s2579_s16  ;;  %s2583_s23 = scalar_lea.vmem (!%p121_p2), [#allocation2], %s2106_s17 }
  0x2b   : > { %2444 = dma.done.wait (%p2542_p8), %s127_s22, 512  }
  0x2c   : > { %2446 = vsyncadd (%p2542_p8), %s127_s22, 4294966784  ;;  %s2107_s24 = sshll.u32 %s2579_s16, 3  ;;  %v149_v0 = vlaneseq  ;;  %s2596_s26 = smov 0  }
  0x2d   : > { %s2594_s25 = scalar_lea.vmem [#allocation5], %s2107_s24 }
  0x2e   : > { %v2590_v1 = vand.u32 127, %v149_v0  ;;  %v2592_v2 = vshrl.u32 %v149_v0, 7 }
  0x2f LB: >> { %v180_v3 = vld [vmem:[%s2583_s23] sm:$0xff]  ;;  %v2482_v4 = vmov 0.0   ;;  %vm181_vm0 = vcmask 64512   ;;  %s2108_s18 = sshll.u32 %s2477_s26, 7  ;;  %vm2483_vm1 = vmmov 0   ;;  %v2111_v15 = vld [vmem:[%s2583_s23 + $0x8] sm:$0xff]  ;;  %s1996_s27 = scalar_lea.vmem %s2594_s25, %s2477_s26 [#allocation5]  ;;  %s2477_s26 = sphi %s2596_s26, %s158_s26  }
  0x30   : >> { %2167 = vmatprep.subr.mxu0 %v2482_v4  ;;  %2172 = vmatprep.subr.mxu1 %v2482_v4  ;;  %v183_v5 = vsel %vm181_vm0, %v180_v3, 0  ;;  %v162_v6 = vstv %s2108_s18  ;;  %vm176_vm2 = vcmp.eq.s32.totalorder %v2592_v2, 2  ;;  %v634_v20 = vsel %vm181_vm0, %v2111_v15, 0  ;;  %v2112_v32 = vld [vmem:[%s2583_s23 + $0x10] sm:$0xff]  ;;  %v2113_v42 = vld [vmem:[%s2583_s23 + $0x18] sm:$0xff]  ;;  %s158_s26 = sadd.s32 1, %s2477_s26  }
  0x31   : >> { %2169 = vmatprep.mubr.msk.f32.mxu0 %vm2483_vm1, %v2482_v4  ;;  %2174 = vmatprep.mubr.msk.f32.mxu1 %vm2483_vm1, %v2482_v4  ;;  %v2610_v7 = vand.u32 4294901760, %v183_v5  ;;  %v163_v8 = vadd.s32 %v162_v6, %v2590_v1  ;;  %vm175_vm3 = vcmp.eq.s32.totalorder %v2592_v2, 1  ;;  %v177_v21 = vsel %vm176_vm2, 1.0, %v2482_v4  ;;  %p155_p8 = scmp.ge.s32.totalorder %s158_s26, 8  }
  0x32   : >> { %vm174_vm4 = vcmp.eq.s32.totalorder %v2592_v2, 0  ;;  %v2620_v25 = vand.u32 4294901760, %v634_v20  ;;  %v1085_v36 = vsel %vm181_vm0, %v2112_v32, 0  ;;  %v1536_v44 = vsel %vm181_vm0, %v2113_v42, 0  ;;  %s2115_s28 = sshll.u32 (%p155_p8), %s2465_s9, 7  ;;  %s2013_s3 = sshll.u32 (%p155_p8), %s2594_s25, 4  ;;  %s2014_s3 = int_to_ptr.vmem [resolvable:$true] %s2013_s3 }
  0x33   : >> { %v252_v9 = vsub.f32 %v183_v5, %v2610_v7  ;;  %v164_v10 = vand.u32 15, %v163_v8  ;;  %v165_v11 = vshra.s32 %v163_v8, 4  ;;  %v2647_v39 = vand.u32 4294901760, %v1085_v36  ;;  %s2011_s2 = scalar_lea.hbm (%p155_p8), %s2794_s1, %s2115_s28  ;;  %s1999_s4 = scalar_lea.sflag (%p155_p8), [#allocation4], %s2579_s16 }
  0x34   : >> { %v703_v30 = vsub.f32 %v634_v20, %v2620_v25  ;;  %v2677_v46 = vand.u32 4294901760, %v1536_v44  ;;  %s2389_s5 = scalar_lea.vmem (%p155_p8), %s2014_s3, 128  ;;  %s2484_s12 = smov (%p155_p8), [#allocation5]  }
  0x35   : >> { %v166_v12 = vcvt.s32.f32 %v164_v10  ;;  %v170_v13 = vcvt.s32.f32 %v165_v11  ;;  %v253_v14 = vand.u32 4294901760, %v252_v9  ;;  %v1154_v41 = vsub.f32 %v1085_v36, %v2647_v39  ;;  %p2390_p12 = scmp.ne.s32.totalorder (%p155_p8), %s2014_s3, %s2389_s5  ;;  %s2393_s13 = sshll.u32 (%p155_p8), %s2484_s12, 4  ;;  %s2394_s13 = int_to_ptr.vmem [resolvable:$false] %s2393_s13 }
  0x36   : >> { %v704_v34 = vand.u32 4294901760, %v703_v30  ;;  %v1605_v48 = vsub.f32 %v1536_v44, %v2677_v46  ;;  %s2395_s15 = scalar_lea.vmem (%p155_p8), %s2394_s13, 256  ;;  %p2396_p3 = scmp.lt.s32.totalorder (%p155_p8), %s2014_s3, %s2394_s13 }
  0x37   : >> { %v167_v16 = vadd.f32 0.5, %v166_v12  ;;  %v171_v17 = vadd.f32 0.5, %v170_v13  ;;  %v254_v22 = vsub.f32 %v252_v9, %v253_v14  ;;  %v1155_v43 = vand.u32 4294901760, %v1154_v41  ;;  %p2391_p0 = pnand (%p155_p8), %p2390_p12, %p2546_p9  ;;  %p2397_p5 = scmp.lt.s32.totalorder (%p155_p8), %s2395_s15, %s2389_s5 }
  0x38   : >> { %v705_v38 = vsub.f32 %v703_v30, %v704_v34  ;;  %v1606_v49 = vand.u32 4294901760, %v1605_v48 }
  0x39   : >> { %v168_v18 = vmul.f32 0.125, %v167_v16  ;;  %v172_v19 = vmul.f32 0.125, %v171_v17  ;;  %v255_v28 = vand.u32 4294901760, %v254_v22  ;;  %v1156_v45 = vsub.f32 %v1154_v41, %v1155_v43  ;;  %p2392_p1 = pneg (%p155_p8), %p2391_p0  ;;  %p2398_p6 = por (%p155_p8), %p2397_p5, %p2396_p3 }
  0x3a   : >> { %v706_v40 = vand.u32 4294901760, %v705_v38  ;;  %v1607_v50 = vsub.f32 %v1605_v48, %v1606_v49 }
  0x3b   : >> { %v2109_v23 = vadd.f32 -1.0, %v168_v18  ;;  %v2110_v24 = vadd.f32 -1.0, %v172_v19  ;;  %v1157_v47 = vand.u32 4294901760, %v1156_v45  ;;  %p2399_p7 = pnand (%p155_p8), %p2398_p6, %p2392_p1 }
  0x3c   : >> { %v1608_v51 = vand.u32 4294901760, %v1607_v50 }
  0x3d   : >> { %v178_v26 = vsel %vm175_vm3, %v2110_v24, %v177_v21 }
  0x3e   : >> { %v179_v27 = vsel %vm174_vm4, %v2109_v23, %v178_v26 }
  0x3f   : >> { %v2622_v29 = vand.u32 4294901760, %v179_v27 }
  0x41   : >> { %2168 = vmatpush3.msra.mxu0 %v2622_v29  ;;  %v2627_v31 = vsub.f32 %v179_v27, %v2622_v29 }
  0x42   : >> { %2170 = vmatmul.mubr.f32.vlgmr.msra.gmra.mxu0 %v255_v28  ;;  %2177 = vmatprep.subr.mxu0 %v2482_v4 }
  0x43   : >> { %v2632_v33 = vand.u32 4294901760, %v2627_v31  ;;  %2178 = vmatpush3.msra.mxu0 %v2627_v31  ;;  %2179 = vmatprep.mubr.msk.f32.mxu0 %vm2483_vm1, %v2482_v4 }
  0x44   : >> { %2187 = vmatprep.subr.mxu0 %v2482_v4 }
  0x45   : >> { %v295_v35 = vsub.f32 %v2627_v31, %v2632_v33 }
  0x46   : >> { %2180 = vmatmul.mubr.f32.vlgmr.msra.gmra.mxu0 %v252_v9 }
  0x47   : >> { %v2641_v37 = vand.u32 4294901760, %v295_v35  ;;  %2188 = vmatpush3.msra.mxu0 %v2632_v33  ;;  %2189 = vmatprep.mubr.msk.f32.mxu0 %vm2483_vm1, %v2482_v4 }
  0x48   : >> { %2197 = vmatprep.subr.mxu0 %v2482_v4 }
  0x49   : >> { %2173 = vmatpush3.msra.mxu1 %v2641_v37 }
  0x4a   : >> { %2175 = vmatmul.mubr.f32.vlgmr.msra.gmra.mxu1 %v2610_v7  ;;  %2182 = vmatprep.subr.mxu1 %v2482_v4 }
  0x4b   : >> { %2183 = vmatpush3.msra.mxu1 %v2622_v29  ;;  %2184 = vmatprep.mubr.msk.f32.mxu1 %vm2483_vm1, %v2482_v4 }
  0x4c   : >> { %2192 = vmatprep.subr.mxu1 %v2482_v4  ;;  %2190 = vmatmul.mubr.f32.vlgmr.msra.gmra.mxu0 %v2610_v7 }
  0x4d   : >> { %2198 = vmatpush3.msra.mxu0 %v2622_v29  ;;  %2199 = vmatprep.mubr.msk.f32.mxu0 %vm2483_vm1, %v2482_v4 }
  0x4e   : >> { %2185 = vmatmul.mubr.f32.vlgmr.msra.gmra.mxu1 %v253_v14  ;;  %2207 = vmatprep.subr.mxu0 %v2482_v4 }
  0x4f   : >> { %2193 = vmatpush3.msra.mxu1 %v2622_v29  ;;  %2194 = vmatprep.mubr.msk.f32.mxu1 %vm2483_vm1, %v2482_v4 }
  0x50   : >> { %2202 = vmatprep.subr.mxu1 %v2482_v4  ;;  %2200 = vmatmul.mubr.f32.vlgmr.msra.gmra.mxu0 %v706_v40 }
  0x51   : >> { %2208 = vmatpush3.msra.mxu0 %v2627_v31  ;;  %2209 = vmatprep.mubr.msk.f32.mxu0 %vm2483_vm1, %v2482_v4 }
  0x52   : >> { %2195 = vmatmul.mubr.f32.vlgmr.msra.gmra.mxu1 %v2610_v7  ;;  %2217 = vmatprep.subr.mxu0 %v2482_v4 }
  0x53   : >> { %2203 = vmatpush3.msra.mxu1 %v2641_v37  ;;  %2204 = vmatprep.mubr.msk.f32.mxu1 %vm2483_vm1, %v2482_v4 }
  0x54   : >> { %2212 = vmatprep.subr.mxu1 %v2482_v4  ;;  %2210 = vmatmul.mubr.f32.vlgmr.msra.gmra.mxu0 %v703_v30 }
  0x55   : >> { %2218 = vmatpush3.msra.mxu0 %v2632_v33  ;;  %2219 = vmatprep.mubr.msk.f32.mxu0 %vm2483_vm1, %v2482_v4 }
  0x56   : >> { %2205 = vmatmul.mubr.f32.vlgmr.msra.gmra.mxu1 %v2620_v25  ;;  %2227 = vmatprep.subr.mxu0 %v2482_v4 }
  0x57   : >> { %2213 = vmatpush3.msra.mxu1 %v2622_v29  ;;  %2214 = vmatprep.mubr.msk.f32.mxu1 %vm2483_vm1, %v2482_v4 }
  0x58   : >> { %2222 = vmatprep.subr.mxu1 %v2482_v4  ;;  %2220 = vmatmul.mubr.f32.vlgmr.msra.gmra.mxu0 %v2620_v25 }
  0x59   : >> { %2228 = vmatpush3.msra.mxu0 %v2622_v29  ;;  %2229 = vmatprep.mubr.msk.f32.mxu0 %vm2483_vm1, %v2482_v4 }
  0x5a   : >> { %2215 = vmatmul.mubr.f32.vlgmr.msra.gmra.mxu1 %v704_v34  ;;  %2237 = vmatprep.subr.mxu0 %v2482_v4 }
  0x5b   : >> { %2223 = vmatpush3.msra.mxu1 %v2622_v29  ;;  %2224 = vmatprep.mubr.msk.f32.mxu1 %vm2483_vm1, %v2482_v4 }
  0x5c   : >> { %2232 = vmatprep.subr.mxu1 %v2482_v4  ;;  %2230 = vmatmul.mubr.f32.vlgmr.msra.gmra.mxu0 %v1157_v47 }
  0x5d   : >> { %2238 = vmatpush3.msra.mxu0 %v2627_v31  ;;  %2239 = vmatprep.mubr.msk.f32.mxu0 %vm2483_vm1, %v2482_v4 }
  0x5e   : >> { %2225 = vmatmul.mubr.f32.vlgmr.msra.gmra.mxu1 %v2620_v25  ;;  %2247 = vmatprep.subr.mxu0 %v2482_v4 }
  0x5f   : >> { %2233 = vmatpush3.msra.mxu1 %v2641_v37  ;;  %2234 = vmatprep.mubr.msk.f32.mxu1 %vm2483_vm1, %v2482_v4 }
  0x60   : >> { %2242 = vmatprep.subr.mxu1 %v2482_v4  ;;  %2240 = vmatmul.mubr.f32.vlgmr.msra.gmra.mxu0 %v1154_v41 }
  0x61   : >> { %2248 = vmatpush3.msra.mxu0 %v2632_v33  ;;  %2249 = vmatprep.mubr.msk.f32.mxu0 %vm2483_vm1, %v2482_v4 }
  0x62   : >> { %2235 = vmatmul.mubr.f32.vlgmr.msra.gmra.mxu1 %v2647_v39  ;;  %2257 = vmatprep.subr.mxu0 %v2482_v4 }
  0x63   : >> { %2243 = vmatpush3.msra.mxu1 %v2622_v29  ;;  %2244 = vmatprep.mubr.msk.f32.mxu1 %vm2483_vm1, %v2482_v4 }
  0x64   : >> { %2252 = vmatprep.subr.mxu1 %v2482_v4  ;;  %2250 = vmatmul.mubr.f32.vlgmr.msra.gmra.mxu0 %v2647_v39 }
  0x65   : >> { %2258 = vmatpush3.msra.mxu0 %v2622_v29  ;;  %2259 = vmatprep.mubr.msk.f32.mxu0 %vm2483_vm1, %v2482_v4 }
  0x66   : >> { %2245 = vmatmul.mubr.f32.vlgmr.msra.gmra.mxu1 %v1155_v43  ;;  %2267 = vmatprep.subr.mxu0 %v2482_v4 }
  0x67   : >> { %2253 = vmatpush3.msra.mxu1 %v2622_v29  ;;  %2254 = vmatprep.mubr.msk.f32.mxu1 %vm2483_vm1, %v2482_v4 }
  0x68   : >> { %2262 = vmatprep.subr.mxu1 %v2482_v4  ;;  %2260 = vmatmul.mubr.f32.vlgmr.msra.gmra.mxu0 %v1608_v51 }
  0x69   : >> { %2268 = vmatpush3.msra.mxu0 %v2627_v31  ;;  %2269 = vmatprep.mubr.msk.f32.mxu0 %vm2483_vm1, %v2482_v4 }
  0x6a   : >> { %2255 = vmatmul.mubr.f32.vlgmr.msra.gmra.mxu1 %v2647_v39  ;;  %2277 = vmatprep.subr.mxu0 %v2482_v4 }
  0x6b   : >> { %2263 = vmatpush3.msra.mxu1 %v2641_v37  ;;  %2264 = vmatprep.mubr.msk.f32.mxu1 %vm2483_vm1, %v2482_v4 }
  0x6c   : >> { %2272 = vmatprep.subr.mxu1 %v2482_v4  ;;  %2270 = vmatmul.mubr.f32.vlgmr.msra.gmra.mxu0 %v1605_v48 }
  0x6d   : >> { %2278 = vmatpush3.msra.mxu0 %v2632_v33  ;;  %2279 = vmatprep.mubr.msk.f32.mxu0 %vm2483_vm1, %v2482_v4 }
  0x6e   : >> { %2265 = vmatmul.mubr.f32.vlgmr.msra.gmra.mxu1 %v2677_v46 }
  0x6f   : >> { %2273 = vmatpush3.msra.mxu1 %v2622_v29  ;;  %2274 = vmatprep.mubr.msk.f32.mxu1 %vm2483_vm1, %v2482_v4 }
  0x70   : >> { %2282 = vmatprep.subr.mxu1 %v2482_v4  ;;  %2280 = vmatmul.mubr.f32.vlgmr.msra.gmra.mxu0 %v2677_v46 }
  0x72   : >> { %2275 = vmatmul.mubr.f32.vlgmr.msra.gmra.mxu1 %v1606_v49 }
  0x73   : >> { %2283 = vmatpush3.msra.mxu1 %v2622_v29  ;;  %2284 = vmatprep.mubr.msk.f32.mxu1 %vm2483_vm1, %v2482_v4 }
  0x76   : >> { %2285 = vmatmul.mubr.f32.vlgmr.msra.gmra.mxu1 %v2677_v46 }
 0x102   : >> { %v257_v52 = vpop.f32.mrf.mxu0 }
 0x104   : >> { %v2171_v53 = vpop.f32.mrf.mxu0 }
 0x106   : >> { %v407_v54 = vpop.f32.mrf.mxu0 }
 0x108   : >> { %v2181_v55 = vpop.f32.mrf.mxu0 }
 0x10a   : >> { %v333_v56 = vpop.f32.mrf.mxu1 }
 0x10b   : >> { %v334_v16 = vadd.f32 %v333_v56, %v257_v52 }
 0x10c   : >> { %v2176_v57 = vpop.f32.mrf.mxu1  ;;  %v555_v58 = vpop.f32.mrf.mxu0 }
 0x10d   : >> { %v408_v23 = vadd.f32 %v407_v54, %v334_v16 }
 0x10e   : >> { %v481_v59 = vpop.f32.mrf.mxu1  ;;  %v2191_v60 = vpop.f32.mrf.mxu0 }
 0x10f   : >> { %v482_v30 = vadd.f32 %v481_v59, %v408_v23 }
 0x110   : >> { %v2186_v61 = vpop.f32.mrf.mxu1  ;;  %v708_v62 = vpop.f32.mrf.mxu0 }
 0x111   : >> { %v556_v37 = vadd.f32 %v555_v58, %v482_v30 }
 0x112   : >> { %v627_v63 = vpop.f32.mrf.mxu1  ;;  %v2201_v0 = vpop.f32.mrf.mxu0 }
 0x113   : >> { %v628_v45 = vadd.f32 %v627_v63, %v556_v37 }
 0x114   : >> { %v2196_v3 = vpop.f32.mrf.mxu1  ;;  %v858_v5 = vpop.f32.mrf.mxu0 }
 0x116   : >> { %v784_v6 = vpop.f32.mrf.mxu1  ;;  %v2211_v7 = vpop.f32.mrf.mxu0 }
 0x117   : >> { %v785_v13 = vadd.f32 %v784_v6, %v708_v62 }
 0x118   : >> { %v2206_v4 = vpop.f32.mrf.mxu1  ;;  %v1006_v8 = vpop.f32.mrf.mxu0 }
 0x119   : >> { %v859_v19 = vadd.f32 %v858_v5, %v785_v13 }
 0x11a   : >> { %v932_v9 = vpop.f32.mrf.mxu1  ;;  %v2221_v10 = vpop.f32.mrf.mxu0 }
 0x11b   : >> { %v933_v27 = vadd.f32 %v932_v9, %v859_v19 }
 0x11c   : >> { %v2216_v11 = vpop.f32.mrf.mxu1  ;;  %v1159_v12 = vpop.f32.mrf.mxu0 }
 0x11d   : >> { %v1007_v34 = vadd.f32 %v1006_v8, %v933_v27 }
 0x11e   : >> { %v1078_v14 = vpop.f32.mrf.mxu1  ;;  %v2231_v15 = vpop.f32.mrf.mxu0 }
 0x11f   : >> { %v1079_v41 = vadd.f32 %v1078_v14, %v1007_v34 }
 0x120   : >> { %v2226_v17 = vpop.f32.mrf.mxu1  ;;  %v1309_v18 = vpop.f32.mrf.mxu0 }
 0x121   : >> { %v1984_v50 = vmin.f32 %v628_v45, %v1079_v41 }
 0x122   : >> { %v1235_v20 = vpop.f32.mrf.mxu1  ;;  %v2241_v21 = vpop.f32.mrf.mxu0 }
 0x123   : >> { %v1236_v22 = vadd.f32 %v1235_v20, %v1159_v12 }
 0x124   : >> { %v2236_v24 = vpop.f32.mrf.mxu1  ;;  %v1457_v25 = vpop.f32.mrf.mxu0 }
 0x125   : >> { %v1310_v26 = vadd.f32 %v1309_v18, %v1236_v22 }
 0x126   : >> { %v1383_v28 = vpop.f32.mrf.mxu1  ;;  %v2251_v29 = vpop.f32.mrf.mxu0 }
 0x127   : >> { %v1384_v31 = vadd.f32 %v1383_v28, %v1310_v26 }
 0x128   : >> { %v2246_v32 = vpop.f32.mrf.mxu1  ;;  %v1610_v33 = vpop.f32.mrf.mxu0 }
 0x129   : >> { %v1458_v38 = vadd.f32 %v1457_v25, %v1384_v31 }
 0x12a   : >> { %v1529_v35 = vpop.f32.mrf.mxu1  ;;  %v2261_v36 = vpop.f32.mrf.mxu0 }
 0x12b   : >> { %v1530_v46 = vadd.f32 %v1529_v35, %v1458_v38 }
 0x12c   : >> { %v2256_v39 = vpop.f32.mrf.mxu1  ;;  %v1760_v40 = vpop.f32.mrf.mxu0 }
 0x12d   : >> { %v1985_v54 = vmin.f32 %v1984_v50, %v1530_v46 }
 0x12e   : >> { %v1686_v42 = vpop.f32.mrf.mxu1  ;;  %v2271_v43 = vpop.f32.mrf.mxu0 }
 0x12f   : >> { %v1687_v44 = vadd.f32 %v1686_v42, %v1610_v33  ;;  %vm1986_vm5 = vcmp.ge.f32.partialorder %v1985_v54, 0.0 }
 0x130   : >> { %v2266_v47 = vpop.f32.mrf.mxu1  ;;  %v1908_v48 = vpop.f32.mrf.mxu0 }
 0x131   : >> { %v1761_v49 = vadd.f32 %v1760_v40, %v1687_v44 }
 0x132   : >> { %v1834_v51 = vpop.f32.mrf.mxu1  ;;  %v2281_v52 = vpop.f32.mrf.mxu0 }
 0x133   : >> { %v1835_v53 = vadd.f32 %v1834_v51, %v1761_v49 }
 0x134   : >> { %v2276_v55 = vpop.f32.mrf.mxu1 }
 0x135   : >> { %v1909_v56 = vadd.f32 %v1908_v48, %v1835_v53 }
 0x136   : >> { %v1980_v57 = vpop.f32.mrf.mxu1 }
 0x137   : >> { %v1981_v58 = vadd.f32 %v1980_v57, %v1909_v56 }
 0x138   : >> { %v2286_v59 = vpop.f32.mrf.mxu1 }
 0x139   : >> { %v1987_v60 = vsel %vm1986_vm5, %v1981_v58, inf }
 0x13a   : >> { %v1988_v61 = vrot.slane %v1987_v60, 4 }
 0x13c   : >> { %v1989_v62 = vmin.f32 %v1987_v60, %v1988_v61 }
 0x13e   : >> { %v1990_v63 = vrot.slane %v1989_v62, 2 }
 0x140   : >> { %v1991_v0 = vmin.f32 %v1989_v62, %v1990_v63 }
 0x142   : >> { %v1992_v3 = vrot.slane %v1991_v0, 1 }
 0x144   : >> { %v1993_v5 = vmin.f32 %v1991_v0, %v1992_v3  ;;  %157 = sbr.rel (!%p155_p8) target bundleno = 47 (0x2f), region = 80 }
 0x146   : >> { %vm1994_vm6 = vcmp.eq.f32.partialorder %v1993_v5, inf }
 0x147   : >> { %v1995_v6 = vsel %vm1994_vm6, -1.0, %v1993_v5 }
 0x148   : >> { %1997 = vst [vmem:[%s1996_s27] sm:$0x1] %v1995_v6 }
 0x149   : > { %2402 = shalt.err (!%p2399_p7)
}
 0x14a   : > { %s2403_s9 = scalar_lea.hbm %s2011_s2, 128  ;;  %s2407_s22 = scalar_lea.hbm %s2794_s1, 256 }
 0x14b   : > { %p2404_p10 = scmp.ne.s32.totalorder %s2011_s2, %s2403_s9  ;;  %p2408_p2 = scmp.lt.s32.totalorder %s2011_s2, %s2794_s1 }
 0x14c   : > { %p2409_p8 = scmp.lt.s32.totalorder %s2407_s22, %s2403_s9 }
 0x14d   : > { %p2405_p4 = pnand %p2404_p10, %p2546_p9 }
 0x14e   : > { %p2410_p12 = por %p2409_p8, %p2408_p2 }
 0x14f   : > { %p2406_p13 = pneg %p2405_p4 }
 0x151   : > { %p2411_p0 = pnand %p2410_p12, %p2406_p13 }
 0x153   : > { %2414 = shalt.err (!%p2411_p0)
}
 0x154   : > { %2289 = dma.vmem_to_hbm [thread:$0]  (%p2546_p9), %s2014_s3, 128, %s2011_s2, %s1999_s4  }
 0x155 PF: > { %s2025_s25 = sand.u32 1, %s2453_s6   ;;  %p2800_p1 = scmp.ge.s32.totalorder %s2473_s11, 2 }
 0x156   : > { %s2026_s26 = scalar_lea.sflag [#allocation4], %s2025_s25 }
 0x157   : > { %p2296_p3 = pnand %p2800_p1, %p2553_p11 }
 0x159   : > { %p2297_p5 = pneg %p2296_p3 }
 0x15b   : > { %2448 = dma.done.wait (%p2297_p5), %s2026_s26, 128  }
 0x15c   : > { %2450 = vsyncadd (%p2297_p5), %s2026_s26, 4294967168  ;;  %s17_s11 = sadd.s32 1, %s2473_s11   ;;  %s2801_s6 = smov %s2457_s7 }
 0x15d   : > { %p14_p6 = scmp.ge.s32.totalorder %s17_s11, 4   ;;  %s2802_s7 = smov %s2461_s8 }
 0x15e   : > { %s2803_s8 = smov %s2551_s20  ;;  %s2804_s9 = smov %s2469_s10 }
 0x15f   : > { %s2805_s10 = smov %s2807_s14  ;;  %16 = sbr.rel (!%p14_p6) target bundleno = 6 (0x6), region = 91 }
 0x164   :  { %2031 = vsyncpa [#allocation3], 1 }
 0x165   :  { %2033 = vsyncpa [#allocation3 + $0x1], 1 }
 0x166   :  { %2034 = vsyncpa [#allocation4], 1 }
 0x167   :  { %2036 = vsyncpa [#allocation4 + $0x1], 1 }

</bundles_post_ra>
